<compile_context>
chip_gen: v6e
topology: v6e:2x2x1
jax: 0.10.0
libtpu: 0.0.40
codegen_flags: <defaults>
</compile_context>

<pallas_src>
import functools

import numpy as np
import jax
import jax.numpy as jnp
from jax import lax
from jax.experimental import pallas as pl
from jax.experimental.pallas import tpu as pltpu


# ---------------- VMEM budgeting & tile planning ----------------

_STATS_FACTOR = 3     # stats pass: double-buffered input + f32 temps ((tr,1) outputs are tiny)
_EW_FACTOR = 5        # scale/shift pass: double-buffered in + out + cast temp
_FUSED_FACTOR = 6     # fused norms: double-buffered in + out + f32 x / centered temps
_TILE_CAP_ELEMS = (4 << 20) // 4   # ~4 MiB per f32 buffer -> keeps >= 4 pipelined grid steps


@functools.lru_cache(maxsize=None)
def _vmem_capacity_bytes():
    try:
        return int(pltpu.get_tpu_info().vmem_capacity_bytes)
    except Exception:
        return 64 << 20  # conservative default (v7x per-TensorCore VMEM)


def _vmem_budget_bytes():
    # budget for all pipeline buffers of one kernel (headroom left for Mosaic scratch)
    return min(int(_vmem_capacity_bytes() * 0.4), 48 << 20)


def _vmem_limit_bytes():
    # scoped-VMEM limit handed to Mosaic; always well below physical capacity
    return min(int(_vmem_capacity_bytes() * 0.7), 100 << 20)


def _compiler_params(dims):
    return pltpu.CompilerParams(dimension_semantics=dims,
                                vmem_limit_bytes=_vmem_limit_bytes())


def _sublane_align(itemsize):
    # sub-32-bit dtypes pack along sublanes: bf16 -> 16 rows, int8/fp8 -> 32 rows
    return {4: 8, 2: 16, 1: 32}.get(int(itemsize), 8)


def _elem_budget(factor, cap=True):
    b = _vmem_budget_bytes() // (4 * factor)      # kernels compute in f32
    if cap:
        b = min(b, _TILE_CAP_ELEMS)
    return max(8 * 128, b)


def _plan_rk(R, K, itemsize, factor):
    """(align, row-tile, K-tile) for the streaming (R, K) kernels. The K tile is a
    multiple of 128 (cdiv tiling + in-kernel tail masking) or the full K."""
    align = _sublane_align(itemsize)
    budget = _elem_budget(factor)
    max_k = max(128, (budget // align // 128) * 128)
    tk = K if K <= max_k else max_k
    max_rows = max(align, budget // tk)
    tr = R if R <= max_rows else max(align, (max_rows // align) * align)
    return align, tr, tk


def _fused_row_tiles(R, K, itemsize):
    """Rows per block for the single-pass (tr, K) norm; None if K doesn't fit VMEM."""
    align = _sublane_align(itemsize)
    raw = _elem_budget(_FUSED_FACTOR, cap=False)
    k_pad = -(-K // 128) * 128
    if align * k_pad > raw:
        return None                      # reduction extent doesn't fit -> two-pass path
    max_rows = max(align, min(raw, _TILE_CAP_ELEMS) // k_pad)
    return R if R <= max_rows else max(align, (max_rows // align) * align)


def _gn_fused_rows(NG, Cg, HW, itemsize):
    """Group rows per block for the single-pass (tr, C/G, H*W) GroupNorm; None if unfit."""
    align = _sublane_align(itemsize)
    per_row = (-(-Cg // align) * align) * (-(-HW // 128) * 128)   # padded VMEM footprint
    raw = _elem_budget(_FUSED_FACTOR, cap=False)
    if per_row > raw:
        return None
    max_rows = max(1, min(raw, _TILE_CAP_ELEMS) // per_row)
    return NG if NG <= max_rows else max_rows


# ---------------- Pallas kernels ----------------

def _row_stats_kernel(x_ref, m0_ref, s1_ref, s2_ref, *, K, tk, nk_p):
    """Per-row shifted sums accumulated over the K grid axis (with tail masking).
    m0 = mean of the partition's first tile (numerical shift),
    s1 = sum(x - m0), s2 = sum((x - m0)^2) over the partition's valid columns."""
    p = pl.program_id(1)
    k = pl.program_id(2)
    x = x_ref[...].astype(jnp.float32)

    @pl.when(k == 0)
    def _init():
        # the first tile of every partition is always fully in-bounds (see _row_stats)
        m0_ref[...] = jnp.mean(x, axis=-1, keepdims=True)
        s1_ref[...] = jnp.zeros_like(s1_ref)
        s2_ref[...] = jnp.zeros_like(s2_ref)

    col0 = (p * nk_p + k) * tk
    valid = (col0 + lax.broadcasted_iota(jnp.int32, x.shape, 1)) < K
    xc = jnp.where(valid, x - m0_ref[...], 0.0)
    s1_ref[...] += jnp.sum(xc, axis=-1, keepdims=True)
    s2_ref[...] += jnp.sum(xc * xc, axis=-1, keepdims=True)


def _row_scale_shift_kernel(x_ref, scale_ref, shift_ref, o_ref):
    """y = x * scale_row + shift_row (mean/rstd/affine pre-folded per row)."""
    x = x_ref[...].astype(jnp.float32)
    o_ref[...] = (x * scale_ref[...] + shift_ref[...]).astype(o_ref.dtype)


def _fused_norm_kernel(x_ref, g_ref, b_ref, o_ref, *, eps):
    """Single-pass row norm: stats + normalize + affine on one resident (tr, K) block.
    g/b broadcast either per row ((tr,1), InstanceNorm) or per column ((1,K), LayerNorm)."""
    x = x_ref[...].astype(jnp.float32)
    mean = jnp.mean(x, axis=-1, keepdims=True)
    xc = x - mean
    var = jnp.mean(xc * xc, axis=-1, keepdims=True)          # biased variance
    y = xc * lax.rsqrt(var + eps) * g_ref[...].astype(jnp.float32) \
        + b_ref[...].astype(jnp.float32)
    o_ref[...] = y.astype(o_ref.dtype)


def _group_norm_kernel(x_ref, g_ref, b_ref, o_ref, *, eps):
    """Single-pass GroupNorm: block (tr, C/G, HW); reduce over (channel, spatial);
    per-channel affine rides the sublane axis as a (tr, C/G, 1) input."""
    x = x_ref[...].astype(jnp.float32)
    cnt = x.shape[1] * x.shape[2]
    mean = jnp.sum(jnp.sum(x, axis=2, keepdims=True), axis=1, keepdims=True) / cnt
    xc = x - mean
    var = jnp.sum(jnp.sum(xc * xc, axis=2, keepdims=True), axis=1, keepdims=True) / cnt
    y = xc * lax.rsqrt(var + eps) * g_ref[...].astype(jnp.float32) \
        + b_ref[...].astype(jnp.float32)
    o_ref[...] = y.astype(o_ref.dtype)


def _layer_norm_packed_kernel(x_ref, g_ref, b_ref, o_ref, *, eps, g_pack, K):
    """LayerNorm for K < 128: g_pack rows are packed along the lane axis so the
    output store is lane-dense; per-segment stats via static lane slices."""
    x = x_ref[...].astype(jnp.float32)                        # (tr, g_pack*K)
    gam = g_ref[...].astype(jnp.float32)                      # (1, K)
    bet = b_ref[...].astype(jnp.float32)                      # (1, K)
    for j in range(g_pack):                                   # static unroll (g_pack <= 16)
        seg = x[:, j * K:(j + 1) * K]
        mean = jnp.mean(seg, axis=-1, keepdims=True)
        xc = seg - mean
        var = jnp.mean(xc * xc, axis=-1, keepdims=True)
        o_ref[:, j * K:(j + 1) * K] = \
            (xc * lax.rsqrt(var + eps) * gam + bet).astype(o_ref.dtype)


def _pixel_norm_kernel(x_ref, o_ref, *, eps):
    """F.normalize(p=2, dim=channel). Block (1, C, t_hw): channel reduction on the
    sublane axis (XLU), H*W lane-dense; rsqrt(max(ss, eps^2)) == 1/max(sqrt(ss), eps)."""
    x = x_ref[...].astype(jnp.float32)                        # (1, C, t_hw)
    ss = jnp.sum(x * x, axis=1, keepdims=True)                # (1, 1, t_hw)
    o_ref[...] = (x * lax.rsqrt(jnp.maximum(ss, eps * eps))).astype(o_ref.dtype)


# ---------------- pallas_call wrappers ----------------

def _row_stats(x2d, *, tr=None, tk=None):
    """x2d: (R, K) -> (m0, s1, s2, cnt): stats are (R, P) float32 shifted partial
    sums, each over `cnt` elements. P > 1 when the K reduction is split across a
    parallel grid axis (so both TensorCores stream it on 2-TC parts)."""
    R, K = x2d.shape
    align, tr_p, tk_p = _plan_rk(R, K, x2d.dtype.itemsize, _STATS_FACTOR)
    tr = tr_p if tr is None else tr
    tk = tk_p if tk is None else tk
    nr, nk = pl.cdiv(R, tr), pl.cdiv(K, tk)
    # 2-way reduction split only when the row axis alone can't occupy two cores and
    # the split keeps every partition's first tile fully in-bounds.
    P = 2 if (nr == 1 and nk >= 2 and nk % 2 == 0 and K % tk == 0) else 1
    nk_p = nk // P
    cnt = K // P
    out = jax.ShapeDtypeStruct((R, P), jnp.float32)
    stat_spec = lambda: pl.BlockSpec((tr, 1), lambda i, p, k: (i, p))
    m0, s1, s2 = pl.pallas_call(
        functools.partial(_row_stats_kernel, K=K, tk=tk, nk_p=nk_p),
        out_shape=(out, out, out),
        grid=(nr, P, nk_p),
        in_specs=[pl.BlockSpec((tr, tk), lambda i, p, k: (i, p * nk_p + k))],
        out_specs=(stat_spec(), stat_spec(), stat_spec()),
        compiler_params=_compiler_params(("parallel", "parallel", "arbitrary")),
    )(x2d)
    return m0, s1, s2, cnt


def _combine_stats(m0, s1, s2, cnt, axis):
    """Combine shifted partial sums (each over `cnt` elements) along `axis`;
    returns (mean, biased var), keepdims=True."""
    axes = axis if isinstance(axis, tuple) else (axis,)
    n_parts = 1
    for a in axes:
        n_parts *= m0.shape[a]
    total = float(cnt) * n_parts
    mean = jnp.sum(m0 * cnt + s1, axis=axes, keepdims=True) / total
    d = m0 - mean
    var = jnp.sum(s2 + 2.0 * d * s1 + cnt * (d * d), axis=axes, keepdims=True) / total
    return mean, var


def _row_scale_shift(x2d, scale, shift):
    """x2d: (R, K); scale/shift: (R, 1) float32 -> y = x*scale + shift, (R, K)."""
    R, K = x2d.shape
    _, tr, tk = _plan_rk(R, K, x2d.dtype.itemsize, _EW_FACTOR)
    return pl.pallas_call(
        _row_scale_shift_kernel,
        out_shape=jax.ShapeDtypeStruct((R, K), x2d.dtype),
        grid=(pl.cdiv(R, tr), pl.cdiv(K, tk)),
        in_specs=[pl.BlockSpec((tr, tk), lambda i, k: (i, k)),
                  pl.BlockSpec((tr, 1), lambda i, k: (i, 0)),
                  pl.BlockSpec((tr, 1), lambda i, k: (i, 0))],
        out_specs=pl.BlockSpec((tr, tk), lambda i, k: (i, k)),
        compiler_params=_compiler_params(("parallel", "parallel")),
    )(x2d, scale.astype(jnp.float32), shift.astype(jnp.float32))


def _fused_row_norm(x2d, g, b, eps, *, per_row):
    """Single-pass (tr, K) norm; g/b are (R, 1) when per_row else (1, K)."""
    R, K = x2d.shape
    tr = _fused_row_tiles(R, K, x2d.dtype.itemsize)
    if tr is None:                                # callers check; degrade gracefully
        tr = min(R, _sublane_align(x2d.dtype.itemsize))
    if per_row:
        gb_spec = lambda: pl.BlockSpec((tr, 1), lambda i: (i, 0))
    else:
        gb_spec = lambda: pl.BlockSpec((1, K), lambda i: (0, 0))
    return pl.pallas_call(
        functools.partial(_fused_norm_kernel, eps=eps),
        out_shape=jax.ShapeDtypeStruct((R, K), x2d.dtype),
        grid=(pl.cdiv(R, tr),),
        in_specs=[pl.BlockSpec((tr, K), lambda i: (i, 0)), gb_spec(), gb_spec()],
        out_specs=pl.BlockSpec((tr, K), lambda i: (i, 0)),
        compiler_params=_compiler_params(("parallel",)),
    )(x2d, g.astype(jnp.float32), b.astype(jnp.float32))


def _fused_group_norm(x3, g3, b3, eps, tr):
    NG, Cg, HW = x3.shape
    return pl.pallas_call(
        functools.partial(_group_norm_kernel, eps=eps),
        out_shape=jax.ShapeDtypeStruct(x3.shape, x3.dtype),
        grid=(pl.cdiv(NG, tr),),
        in_specs=[pl.BlockSpec((tr, Cg, HW), lambda i: (i, 0, 0)),
                  pl.BlockSpec((tr, Cg, 1), lambda i: (i, 0, 0)),
                  pl.BlockSpec((tr, Cg, 1), lambda i: (i, 0, 0))],
        out_specs=pl.BlockSpec((tr, Cg, HW), lambda i: (i, 0, 0)),
        compiler_params=_compiler_params(("parallel",)),
    )(x3, g3.astype(jnp.float32), b3.astype(jnp.float32))


def _pixel_norm(x3d, eps):
    N, C, HW = x3d.shape
    align = _sublane_align(x3d.dtype.itemsize)
    budget = _elem_budget(_FUSED_FACTOR)
    pad_c = -(-C // align) * align
    max_hw = max(128, (budget // pad_c // 128) * 128)
    t_hw = HW if HW <= max_hw else max_hw
    return pl.pallas_call(
        functools.partial(_pixel_norm_kernel, eps=eps),
        out_shape=jax.ShapeDtypeStruct((N, C, HW), x3d.dtype),
        grid=(N, pl.cdiv(HW, t_hw)),
        in_specs=[pl.BlockSpec((1, C, t_hw), lambda n, h: (n, 0, h))],
        out_specs=pl.BlockSpec((1, C, t_hw), lambda n, h: (n, 0, h)),
        compiler_params=_compiler_params(("parallel", "parallel")),
    )(x3d)


def _layer_norm(x2d, gamma, beta, eps):
    R, K = x2d.shape
    g_pack = 128 // K if (0 < K < 128 and 128 % K == 0) else 1
    if 1 < g_pack <= 16 and R % g_pack == 0:
        # lane-pack g_pack rows per block row -> lane-dense (multiple-of-128) stores
        Rp, Kp = R // g_pack, g_pack * K
        tr = _fused_row_tiles(Rp, Kp, x2d.dtype.itemsize)
        y = pl.pallas_call(
            functools.partial(_layer_norm_packed_kernel, eps=eps, g_pack=g_pack, K=K),
            out_shape=jax.ShapeDtypeStruct((Rp, Kp), x2d.dtype),
            grid=(pl.cdiv(Rp, tr),),
            in_specs=[pl.BlockSpec((tr, Kp), lambda i: (i, 0)),
                      pl.BlockSpec((1, K), lambda i: (0, 0)),
                      pl.BlockSpec((1, K), lambda i: (0, 0))],
            out_specs=pl.BlockSpec((tr, Kp), lambda i: (i, 0)),
            compiler_params=_compiler_params(("parallel",)),
        )(x2d.reshape(Rp, Kp), gamma.reshape(1, K).astype(jnp.float32),
          beta.reshape(1, K).astype(jnp.float32))
        return y.reshape(R, K)
    # general path: fused stats + affine over a (tr, K) block.
    # TODO(synk): a K-tiled two-pass variant would be needed for hidden dims so large
    # that even `align` rows x K exceed the VMEM budget.
    return _fused_row_norm(x2d, gamma.reshape(1, K), beta.reshape(1, K), eps,
                           per_row=False)


# ---------------- NormLayer ----------------

class NormLayer:
    """JAX/Pallas port of models.blocks.NormLayer (PyTorch default init:
    gamma=1, beta=0; BatchNorm uses training-mode batch statistics)."""

    def __init__(self, channels, normalize_shape=None, norm_type='bn'):
        norm_type = norm_type.lower()
        self.norm_type = norm_type
        self.channels = channels
        self.eps = 1e-5
        if norm_type in ('bn', 'in', 'gn'):
            if norm_type == 'gn':
                self.num_groups = 32
                assert channels % self.num_groups == 0, \
                    "GroupNorm(32, C) requires C % 32 == 0"
            self.gamma = jnp.ones((channels,), jnp.float32)
            self.beta = jnp.zeros((channels,), jnp.float32)
        elif norm_type == 'layer':
            shape = normalize_shape if isinstance(normalize_shape, (tuple, list)) \
                else (normalize_shape,)
            self.normalize_shape = tuple(int(s) for s in shape)
            self.gamma = jnp.ones(self.normalize_shape, jnp.float32)
            self.beta = jnp.zeros(self.normalize_shape, jnp.float32)
        elif norm_type in ('pixel', 'none'):
            pass
        else:
            raise ValueError('Norm type {} not support.'.format(norm_type))

    def __call__(self, x):
        nt = self.norm_type
        if nt == 'none':
            return x

        if nt == 'bn':
            # BatchNorm2d (training-mode forward): per-channel stats over (N,H,W).
            # Two passes are inherent (cross-sample combine); shifted partial sums.
            # TODO(synk): running_mean/var buffers (eval mode, momentum) not modeled.
            N, C, H, W = x.shape
            K = H * W
            x2 = x.reshape(N * C, K)                       # free reshape, no transpose
            m0, s1, s2, cnt = _row_stats(x2)
            P = m0.shape[1]
            mean, var = _combine_stats(m0.reshape(N, C, P), s1.reshape(N, C, P),
                                       s2.reshape(N, C, P), cnt, axis=(0, 2))
            mean_c = mean.reshape(C)
            var_c = var.reshape(C)
            scale_c = self.gamma * lax.rsqrt(var_c + self.eps)
            shift_c = self.beta - mean_c * scale_c
            scale = jnp.broadcast_to(scale_c[None, :], (N, C)).reshape(N * C, 1)
            shift = jnp.broadcast_to(shift_c[None, :], (N, C)).reshape(N * C, 1)
            return _row_scale_shift(x2, scale, shift).reshape(N, C, H, W)

        if nt == 'in':
            # InstanceNorm2d(C, affine=True): per-(n,c) stats over (H,W).
            N, C, H, W = x.shape
            K = H * W
            x2 = x.reshape(N * C, K)
            g_rows = jnp.tile(self.gamma, N).reshape(N * C, 1)
            b_rows = jnp.tile(self.beta, N).reshape(N * C, 1)
            if _fused_row_tiles(N * C, K, x.dtype.itemsize) is not None:
                # single pass: 1 read + 1 write
                return _fused_row_norm(x2, g_rows, b_rows, self.eps,
                                       per_row=True).reshape(N, C, H, W)
            # fallback: streaming two-pass when H*W doesn't fit a VMEM tile
            m0, s1, s2, cnt = _row_stats(x2)
            mean, var = _combine_stats(m0, s1, s2, cnt, axis=1)        # (N*C, 1)
            scale = g_rows * lax.rsqrt(var + self.eps)
            shift = b_rows - mean * scale
            return _row_scale_shift(x2, scale, shift).reshape(N, C, H, W)

        if nt == 'gn':
            # GroupNorm(32, C): per-(n,g) stats over (C/G, H, W), per-channel affine.
            N, C, H, W = x.shape
            G = self.num_groups
            Cg = C // G
            HW = H * W
            g3 = jnp.tile(self.gamma.reshape(G, Cg), (N, 1)).reshape(N * G, Cg, 1)
            b3 = jnp.tile(self.beta.reshape(G, Cg), (N, 1)).reshape(N * G, Cg, 1)
            tr = _gn_fused_rows(N * G, Cg, HW, x.dtype.itemsize)
            if tr is not None:
                # single pass: stats + per-channel affine on one resident group block
                y = _fused_group_norm(x.reshape(N * G, Cg, HW), g3, b3, self.eps, tr)
                return y.reshape(N, C, H, W)
            # fallback: streaming two-pass; per-channel affine folded into the
            # per-row scale/shift of the normalize pass.
            m0, s1, s2, cnt = _row_stats(x.reshape(N * G, Cg * HW))
            mean, var = _combine_stats(m0, s1, s2, cnt, axis=1)
            rstd_c = jnp.repeat(lax.rsqrt(var + self.eps).reshape(N, G), Cg, axis=1)
            mean_c = jnp.repeat(mean.reshape(N, G), Cg, axis=1)        # (N, C), tiny
            scale = (self.gamma[None, :] * rstd_c).reshape(N * C, 1)
            shift = (self.beta[None, :]
                     - mean_c * self.gamma[None, :] * rstd_c).reshape(N * C, 1)
            return _row_scale_shift(x.reshape(N * C, HW),
                                    scale, shift).reshape(N, C, H, W)

        if nt == 'pixel':
            # F.normalize(x, p=2, dim=1): L2 along channels, no transpose.
            N, C, H, W = x.shape
            return _pixel_norm(x.reshape(N, C, H * W), 1e-12).reshape(N, C, H, W)

        if nt == 'layer':
            # LayerNorm(normalize_shape): stats over the trailing normalized dims.
            k = len(self.normalize_shape)
            assert tuple(x.shape[-k:]) == self.normalize_shape
            lead = x.shape[:-k]
            R = int(np.prod(lead)) if lead else 1
            K = int(np.prod(self.normalize_shape))
            y2 = _layer_norm(x.reshape(R, K), self.gamma, self.beta, self.eps)
            return y2.reshape(x.shape)

        raise ValueError(nt)


# ---------------- pure-JAX references for verification ----------------

def _ref_bn(x, eps=1e-5):
    m = jnp.mean(x, axis=(0, 2, 3), keepdims=True)
    v = jnp.mean(jnp.square(x - m), axis=(0, 2, 3), keepdims=True)
    return (x - m) / jnp.sqrt(v + eps)


def _ref_in(x, eps=1e-5):
    m = jnp.mean(x, axis=(2, 3), keepdims=True)
    v = jnp.mean(jnp.square(x - m), axis=(2, 3), keepdims=True)
    return (x - m) / jnp.sqrt(v + eps)


def _ref_gn(x, groups=32, eps=1e-5):
    N, C, H, W = x.shape
    xr = x.reshape(N, groups, -1)
    m = jnp.mean(xr, axis=-1, keepdims=True)
    v = jnp.mean(jnp.square(xr - m), axis=-1, keepdims=True)
    return ((xr - m) / jnp.sqrt(v + eps)).reshape(N, C, H, W)


def _ref_pixel(x, eps=1e-12):
    nrm = jnp.sqrt(jnp.sum(x * x, axis=1, keepdims=True))
    return x / jnp.maximum(nrm, eps)


def _ref_layer(x, eps=1e-5):
    m = jnp.mean(x, axis=-1, keepdims=True)
    v = jnp.mean(jnp.square(x - m), axis=-1, keepdims=True)
    return (x - m) / jnp.sqrt(v + eps)


if __name__ == "__main__":
    key = jax.random.PRNGKey(0)
    k1, k2, k3, k4, k5 = jax.random.split(key, 5)
    x = jax.random.normal(k1, (2, 4, 16, 16), dtype=jnp.float32)     # bn/in/pixel/none
    xg = jax.random.normal(k2, (2, 64, 8, 8), dtype=jnp.float32)     # gn (C % 32 == 0)
    xl = jax.random.normal(k3, (2, 8, 32), dtype=jnp.float32)        # layer (hidden=32)

    tol = dict(rtol=1e-4, atol=1e-4)

    # Stats kernel: masked K tail (K = 500 is not a multiple of the 128-wide tile).
    xr = jax.random.normal(k4, (16, 500), dtype=jnp.float32) * 2.0 + 3.0
    m0, s1, s2, cnt = _row_stats(xr, tr=8, tk=128)
    mean, var = _combine_stats(m0, s1, s2, cnt, axis=1)
    jax.block_until_ready(var)
    np.testing.assert_allclose(np.asarray(mean)[:, 0], np.asarray(jnp.mean(xr, axis=1)),
                               rtol=1e-5, atol=1e-5)
    np.testing.assert_allclose(np.asarray(var)[:, 0], np.asarray(jnp.var(xr, axis=1)),
                               rtol=1e-4, atol=1e-4)

    # Stats kernel: 2-way parallel split of the K reduction (small R, tiled K).
    xs = jax.random.normal(k5, (4, 512), dtype=jnp.float32) * 0.5 - 1.0
    m0, s1, s2, cnt = _row_stats(xs, tr=4, tk=128)
    assert m0.shape == (4, 2) and cnt == 256
    mean, var = _combine_stats(m0, s1, s2, cnt, axis=1)
    jax.block_until_ready(var)
    np.testing.assert_allclose(np.asarray(mean)[:, 0], np.asarray(jnp.mean(xs, axis=1)),
                               rtol=1e-5, atol=1e-5)
    np.testing.assert_allclose(np.asarray(var)[:, 0], np.asarray(jnp.var(xs, axis=1)),
                               rtol=1e-4, atol=1e-4)

    out_bn = jax.block_until_ready(NormLayer(4, norm_type='bn')(x))
    np.testing.assert_allclose(np.asarray(out_bn), np.asarray(_ref_bn(x)), **tol)

    out_in = jax.block_until_ready(NormLayer(4, norm_type='in')(x))
    np.testing.assert_allclose(np.asarray(out_in), np.asarray(_ref_in(x)), **tol)

    out_gn = jax.block_until_ready(NormLayer(64, norm_type='gn')(xg))
    np.testing.assert_allclose(np.asarray(out_gn), np.asarray(_ref_gn(xg)), **tol)

    out_px = jax.block_until_ready(NormLayer(4, norm_type='pixel')(x))
    np.testing.assert_allclose(np.asarray(out_px), np.asarray(_ref_pixel(x)), **tol)

    out_ln = jax.block_until_ready(NormLayer(32, normalize_shape=32,
                                             norm_type='layer')(xl))
    np.testing.assert_allclose(np.asarray(out_ln), np.asarray(_ref_layer(xl)), **tol)

    out_none = jax.block_until_ready(NormLayer(4, norm_type='none')(x))
    np.testing.assert_allclose(np.asarray(out_none), np.asarray(x), **tol)

    print("KERNEL_OK")
</pallas_src>

<mosaic_0001>
module attributes {stable_mosaic.version = 11 : i64} {
  func.func @_row_stats_kernel(%arg0: i32, %arg1: i32, %arg2: i32, %arg3: memref<8x128xf32, #tpu.memory_space<vmem>>, %arg4: memref<8x1xf32, #tpu.memory_space<vmem>>, %arg5: memref<8x1xf32, #tpu.memory_space<vmem>>, %arg6: memref<8x1xf32, #tpu.memory_space<vmem>>) attributes {dimension_semantics = [#tpu.dimension_semantics<parallel>, #tpu.dimension_semantics<parallel>, #tpu.dimension_semantics<arbitrary>], iteration_bounds = array<i64: 2, 1, 4>, scalar_prefetch = 0 : i64, scratch_operands = 0 : i64, tpu.core_type = #tpu.core_type<tc>, window_params = [{transform_indices = @transform_0, window_bounds = array<i64: 8, 128>}, {transform_indices = @transform_1, window_bounds = array<i64: 8, 1>}, {transform_indices = @transform_2, window_bounds = array<i64: 8, 1>}, {transform_indices = @transform_3, window_bounds = array<i64: 8, 1>}]} {
    %c0 = arith.constant 0 : index
    %c0_0 = arith.constant 0 : index
    %0 = vector.load %arg3[%c0, %c0_0] : memref<8x128xf32, #tpu.memory_space<vmem>>, vector<8x128xf32>
    %c0_i32 = arith.constant 0 : i32
    %1 = arith.cmpi eq, %arg2, %c0_i32 : i32
    %2 = arith.extui %1 : i1 to i32
    %c0_i32_1 = arith.constant 0 : i32
    %3 = arith.cmpi ne, %2, %c0_i32_1 : i32
    scf.if %3 {
      %cst_14 = arith.constant dense<0.000000e+00> : vector<8xf32>
      %28 = vector.multi_reduction <add>, %0, %cst_14 [1] : vector<8x128xf32> to vector<8xf32>
      %29 = vector.shape_cast %28 : vector<8xf32> to vector<8x1xf32>
      %cst_15 = arith.constant 1.280000e+02 : f32
      %30 = vector.broadcast %cst_15 : f32 to vector<8x1xf32>
      %31 = arith.divf %29, %30 : vector<8x1xf32>
      %c0_16 = arith.constant 0 : index
      %c0_17 = arith.constant 0 : index
      %32 = vector.load %arg4[%c0_16, %c0_17] : memref<8x1xf32, #tpu.memory_space<vmem>>, vector<8x1xf32>
      tpu.vector_store %arg4[%c0_16, %c0_17], %31 {strides = array<i32>} : memref<8x1xf32, #tpu.memory_space<vmem>>, vector<8x1xf32>,
      %cst_18 = arith.constant 0.000000e+00 : f32
      %33 = vector.broadcast %cst_18 : f32 to vector<8x1xf32>
      %c0_19 = arith.constant 0 : index
      %c0_20 = arith.constant 0 : index
      %34 = vector.load %arg5[%c0_19, %c0_20] : memref<8x1xf32, #tpu.memory_space<vmem>>, vector<8x1xf32>
      tpu.vector_store %arg5[%c0_19, %c0_20], %33 {strides = array<i32>} : memref<8x1xf32, #tpu.memory_space<vmem>>, vector<8x1xf32>,
      %cst_21 = arith.constant 0.000000e+00 : f32
      %35 = vector.broadcast %cst_21 : f32 to vector<8x1xf32>
      %c0_22 = arith.constant 0 : index
      %c0_23 = arith.constant 0 : index
      %36 = vector.load %arg6[%c0_22, %c0_23] : memref<8x1xf32, #tpu.memory_space<vmem>>, vector<8x1xf32>
      tpu.vector_store %arg6[%c0_22, %c0_23], %35 {strides = array<i32>} : memref<8x1xf32, #tpu.memory_space<vmem>>, vector<8x1xf32>,
    } else {
    }
    %c4_i32 = arith.constant 4 : i32
    %4 = arith.muli %arg1, %c4_i32 : i32
    %5 = arith.addi %4, %arg2 : i32
    %c128_i32 = arith.constant 128 : i32
    %6 = arith.muli %5, %c128_i32 : i32
    %7 = tpu.iota {dimensions = array<i32: 1>} : vector<8x128xi32>
    %8 = vector.broadcast %6 : i32 to vector<8x128xi32>
    %9 = arith.addi %8, %7 : vector<8x128xi32>
    %c500_i32 = arith.constant 500 : i32
    %10 = vector.broadcast %c500_i32 : i32 to vector<8x128xi32>
    %11 = arith.cmpi slt, %9, %10 : vector<8x128xi32>
    %c0_2 = arith.constant 0 : index
    %c0_3 = arith.constant 0 : index
    %12 = vector.load %arg4[%c0_2, %c0_3] : memref<8x1xf32, #tpu.memory_space<vmem>>, vector<8x1xf32>
    %13 = vector.broadcast %12 : vector<8x1xf32> to vector<8x128xf32>
    %14 = arith.subf %0, %13 : vector<8x128xf32>
    %cst = arith.constant 0.000000e+00 : f32
    %15 = vector.broadcast %cst : f32 to vector<8x128xf32>
    %16 = arith.select %11, %14, %15 : vector<8x128xi1>, vector<8x128xf32>
    %c0_4 = arith.constant 0 : index
    %c0_5 = arith.constant 0 : index
    %17 = vector.load %arg5[%c0_4, %c0_5] : memref<8x1xf32, #tpu.memory_space<vmem>>, vector<8x1xf32>
    %cst_6 = arith.constant dense<0.000000e+00> : vector<8xf32>
    %18 = vector.multi_reduction <add>, %16, %cst_6 [1] : vector<8x128xf32> to vector<8xf32>
    %19 = vector.shape_cast %18 : vector<8xf32> to vector<8x1xf32>
    %20 = arith.addf %17, %19 : vector<8x1xf32>
    %c0_7 = arith.constant 0 : index
    %c0_8 = arith.constant 0 : index
    %21 = vector.load %arg5[%c0_7, %c0_8] : memref<8x1xf32, #tpu.memory_space<vmem>>, vector<8x1xf32>
    tpu.vector_store %arg5[%c0_7, %c0_8], %20 {strides = array<i32>} : memref<8x1xf32, #tpu.memory_space<vmem>>, vector<8x1xf32>,
    %c0_9 = arith.constant 0 : index
    %c0_10 = arith.constant 0 : index
    %22 = vector.load %arg6[%c0_9, %c0_10] : memref<8x1xf32, #tpu.memory_space<vmem>>, vector<8x1xf32>
    %23 = arith.mulf %16, %16 : vector<8x128xf32>
    %cst_11 = arith.constant dense<0.000000e+00> : vector<8xf32>
    %24 = vector.multi_reduction <add>, %23, %cst_11 [1] : vector<8x128xf32> to vector<8xf32>
    %25 = vector.shape_cast %24 : vector<8xf32> to vector<8x1xf32>
    %26 = arith.addf %22, %25 : vector<8x1xf32>
    %c0_12 = arith.constant 0 : index
    %c0_13 = arith.constant 0 : index
    %27 = vector.load %arg6[%c0_12, %c0_13] : memref<8x1xf32, #tpu.memory_space<vmem>>, vector<8x1xf32>
    tpu.vector_store %arg6[%c0_12, %c0_13], %26 {strides = array<i32>} : memref<8x1xf32, #tpu.memory_space<vmem>>, vector<8x1xf32>,
    return
  }
  func.func @transform_0(%arg0: i32, %arg1: i32, %arg2: i32) -> (i32, i32) {
    %c4_i32 = arith.constant 4 : i32
    %0 = arith.muli %arg1, %c4_i32 : i32
    %1 = arith.addi %0, %arg2 : i32
    %c0_i32 = arith.constant 0 : i32
    return %arg0, %1 : i32, i32
  }
  func.func @transform_1(%arg0: i32, %arg1: i32, %arg2: i32) -> (i32, i32) {
    %c0_i32 = arith.constant 0 : i32
    return %arg0, %arg1 : i32, i32
  }
  func.func @transform_2(%arg0: i32, %arg1: i32, %arg2: i32) -> (i32, i32) {
    %c0_i32 = arith.constant 0 : i32
    return %arg0, %arg1 : i32, i32
  }
  func.func @transform_3(%arg0: i32, %arg1: i32, %arg2: i32) -> (i32, i32) {
    %c0_i32 = arith.constant 0 : i32
    return %arg0, %arg1 : i32, i32
  }
}

</mosaic_0001>

<bundles_post_ra>
// kernel: tpu_custom_call.1
= control target key start
LH: loop header
LB: loop body
LE: loop exit
PB: predicated region body
PF: predicated region fallthrough
CT: control target
= control target key end

     0   :  { %9 = vsyncpa [#allocation3], 0  ;;  %s830_s0 = inlined_call_operand.hbm [shape: f32[16,500], index: 0, kind: input, shape index: {}]   ;;  %s831_s1 = inlined_call_operand.vmem [shape: f32[16,1], index: 1, kind: output, shape index: {0}]   ;;  %s832_s2 = inlined_call_operand.vmem [shape: f32[16,1], index: 2, kind: output, shape index: {1}]   ;;  %s833_s3 = inlined_call_operand.vmem [shape: f32[16,1], index: 3, kind: output, shape index: {2}]  }
   0x1   :  { %11 = vsyncpa [#allocation3 + $0x1], 0  ;;  %s687_s12 = smov 0   ;;  %s689_s13 = smov 0  }
   0x2   :  { %s691_s14 = smov 0   ;;  %s693_s15 = smov 0  }
   0x3   :  { %s695_s16 = smov 0   ;;  %s697_s17 = smov 0  }
   0x4   :  { %s699_s18 = smov 0   ;;  %s701_s19 = smov 0  }
   0x5 LB: > { %s478_s20 = sadd.s32 4294967295, %s662_s19   ;;  %s29_s21 = sadd.s32 1, %s654_s17  ;;  %s662_s19 = sphi %s701_s19, %s17_s19   ;;  %s658_s18 = sphi %s699_s18, %s843_s18   ;;  %s654_s17 = sphi %s697_s17, %s842_s17   ;;  %s650_s16 = sphi %s695_s16, %s841_s16   ;;  %s646_s15 = sphi %s693_s15, %s840_s15   ;;  %s642_s14 = sphi %s691_s14, %s839_s14   ;;  %s638_s13 = sphi %s689_s13, %s838_s13   ;;  %s634_s12 = sphi %s687_s12, %s837_s12  }
   0x6   : > { %p30_p0 = scmp.ge.s32.totalorder %s29_s21, 4  ;;  %s36_s22 = sadd.s32 1, %s658_s18 }
   0x7   : > { %s49_s23 = sadd.s32 1, %s642_s14  ;;  %p56_p1 = scmp.ne.s32.totalorder %s642_s14, %s638_s13 }
   0x8   : > { %s845_s21 = smov (%p30_p0, %s29_s21), 0  ;;  %s847_s22 = smov (!%p30_p0, %s36_s22), %s658_s18 }
   0x9   : > { %s45_s24 = ssub.s32 %s654_s17, %s845_s21  ;;  %p57_p2 = scmp.eq.s32.totalorder %s662_s19, 0 }
   0xa   : > { %p38_p3 = scmp.ge.s32.totalorder %s847_s22, 2  ;;  %p62_p4 = scmp.ne.s32.totalorder %s638_s13, %s634_s12 }
   0xb   : > { %p738_p5 = por %p57_p2, %p56_p1  ;;  %p63_p6 = scmp.eq.s32.totalorder %s478_s20, 0 }
   0xc   : > { %s849_s22 = smov (%p38_p3, %s847_s22), 0  ;;  %p500_p8 = scmp.lt.s32.totalorder %s662_s19, 8 }
   0xd   : > { %p744_p7 = por %p63_p6, %p62_p4  ;;  %s44_s27 = ssub.s32 %s658_s18, %s849_s22 }
   0xe   : > { %s46_s28 = sor.u32 %s45_s24, %s44_s27  ;;  %s170_s29 = sand.u32 1, %s642_s14  }
   0xf   : > { %p47_p9 = scmp.eq.s32.totalorder %s46_s28, 0  ;;  %s482_s30 = sshll.u32 %s170_s29, 3 }
  0x10   : > { %s483_s4 = sshll.u32 %s658_s18, 2  ;;  %s174_s8 = scalar_lea.vmem [#allocation2], %s482_s30 }
  0x11   : > { %s754_s5 = scalar_select %p47_p9, %s642_s14, %s49_s23  }
  0x12   : > { %s181_s6 = sadd.s32 %s654_s17, %s483_s4  ;;  %s185_s9 = sshll.u32 %s174_s8, 4  ;;  %s186_s9 = int_to_ptr.vmem [resolvable:$true] %s185_s9 }
  0x13   : > { %s484_s7 = sshll.u32 %s181_s6, 7  ;;  %p764_p10 = pnand %p500_p8, %p738_p5 }
  0x14   : > { %s183_s12 = scalar_lea.hbm %s830_s0, %s484_s7  ;;  %p485_p11 = scmp.ge.s32.totalorder %s662_s19, 1 }
  0x15   : > { %p190_p12 = scmp.lt.s32.totalorder %s662_s19, 9  ;;  %s171_s23 = scalar_lea.sflag [#allocation3], %s170_s29 }
  0x16   : > { %p570_p13 = pneg %p764_p10  ;;  %s581_s24 = scalar_lea.vmem %s186_s9, 128 }
  0x17   : > { %p582_p0 = scmp.ne.s32.totalorder %s186_s9, %s581_s24  ;;  %s664_s27 = smov [#allocation2]  }
  0x18   : > { %s586_s28 = sshll.u32 %s664_s27, 4  ;;  %s587_s28 = int_to_ptr.vmem [resolvable:$false] %s586_s28 }
  0x19   : > { %p584_p1 = pnand %p582_p0, %p570_p13  ;;  %s588_s30 = scalar_lea.vmem %s587_s28, 256 }
  0x1a   : > { %p589_p3 = scmp.lt.s32.totalorder %s186_s9, %s587_s28  ;;  %p590_p4 = scmp.lt.s32.totalorder %s588_s30, %s581_s24 }
  0x1b   : > { %p585_p2 = pneg %p584_p1 }
  0x1c   : > { %p591_p5 = por %p590_p4, %p589_p3 }
  0x1e   : > { %p592_p6 = pnand %p591_p5, %p585_p2 }
  0x20   : > { %595 = shalt.err (!%p592_p6)
}
  0x21   : > { %499 = dma.hbm_to_vmem [thread:$0]  (!%p764_p10), %s183_s12, 128, %s186_s9, %s171_s23  }
  0x22   : > { %p191_p8 = pnand %p485_p11, %p190_p12 }
  0x23   : > { %s196_s25 = sand.u32 (!%p191_p8), 1, %s638_s13  }
  0x24   : > { %194 = sbr.rel (%p191_p8) target bundleno = 467 (0x1d3), region = 24  ;;  %s486_s29 = sshll.u32 (!%p191_p8), %s196_s25, 3 }
  0x25   : > { %s197_s4 = scalar_lea.sflag (!%p191_p8), [#allocation3], %s196_s25  ;;  %s200_s6 = scalar_lea.vmem (!%p191_p8), [#allocation2], %s486_s29 }
  0x29   : > { %629 = dma.done.wait (%p744_p7), %s197_s4, 128  }
  0x2a   : > { %631 = vsyncadd (%p744_p7), %s197_s4, 4294967168  ;;  %p241_p9 = scmp.lt.s32.totalorder %s650_s16, 1  ;;  %v262_v0 = vld [vmem:[%s200_s6] sm:$0xff]  ;;  %p490_p7 = scmp.ne.s32.totalorder %s646_s15, 0 }
  0x2c   : > { %s851_s16 = smov (!%p241_p9, %s650_s16), 1  ;;  %266 = sbr.rel (%p490_p7) target bundleno = 190 (0xbe), region = 32 }
  0x2d   : > { %s487_s7 = sshll.u32 %s851_s16, 3 }
  0x2e   : > { %s247_s10 = scalar_lea.vmem %s831_s1, %s487_s7  ;;  %s791_s20 = scalar_lea.vmem %s832_s2, %s487_s7 }
  0x2f   : > { %s796_s27 = scalar_lea.vmem %s833_s3, %s487_s7 }
  0x31   : > { %267 = vadd.xlane.f32.xlu0 %v262_v0  ;;  %vm271_vm0 = vcmask 7168   ;;  %v665_v1 = vmov 0.0  }
  0x32   : > { %273 = vst.msk [vmem:[%s791_s20] sm:$0xff] %vm271_vm0, %v665_v1  ;;  %274 = vst.msk [vmem:[%s796_s27] sm:$0xff] %vm271_vm0, %v665_v1 }
  0xba   : > { %v268_v2 = vpop.xlane.xlu0 %267 }
  0xbb   : > { %v270_v3 = vmul.f32 0.0078125, %v268_v2 }
  0xbd   : > { %272 = vst.msk [vmem:[%s247_s10] sm:$0xff] %vm271_vm0, %v270_v3 }
  0xbe PF: > { %v666_v5 = vmov 0   ;;  %v278_v6 = vlaneseq  ;;  %s491_s16 = sshll.u32 %s646_s15, 7  ;;  %v291_v14 = vld [vmem:[%s791_s20] sm:$0xff]  ;;  %vm295_vm2 = vcmask 7168  }
  0xbf   : > { %567 = vset.pattern.permute.xlu0 %v666_v5  ;;  %v280_v8 = vstv %s491_s16  ;;  %v297_v16 = vld [vmem:[%s796_s27] sm:$0xff] }
  0xc0   : > { %v279_v7 = vand.u32 127, %v278_v6 }
  0xc2   : > { %v281_v9 = vadd.s32 %v280_v8, %v279_v7 }
  0xc4   : > { %v283_v4 = vld [vmem:[%s247_s10] sm:$0xff]  ;;  %vm282_vm1 = vcmp.lt.s32.totalorder %v281_v9, 500 }
  0xc5   : > { %286 = vperm.xlu0 %567, %v283_v4  }
 0x140   : > { %v287_v10 = vpop.permute.xlu0 %286 }
 0x141   : > { %v289_v11 = vsub.f32 %v262_v0, %v287_v10 }
 0x143   : > { %v290_v12 = vsel %vm282_vm1, %v289_v11, 0.0 }
 0x144   : > { %292 = vadd.xlane.f32.xlu0 %v290_v12  ;;  %v298_v13 = vmul.f32 %v290_v12, %v290_v12 }
 0x146   : > { %299 = vadd.xlane.f32.xlu1 %v298_v13 }
 0x1cd   : > { %v293_v15 = vpop.xlane.xlu0 %292 }
 0x1ce   : > { %v294_v17 = vadd.f32 %v293_v15, %v291_v14 }
 0x1cf   : > { %v300_v18 = vpop.xlane.xlu1 %299 }
 0x1d0   : > { %296 = vst.msk [vmem:[%s791_s20] sm:$0xff] %vm295_vm2, %v294_v17  ;;  %v301_v19 = vadd.f32 %v300_v18, %v297_v16 }
 0x1d2   : > { %302 = vst.msk [vmem:[%s796_s27] sm:$0xff] %vm295_vm2, %v301_v19 }
 0x1d3 PF: > { %s17_s19 = sadd.s32 1, %s662_s19   ;;  %s837_s12 = smov %s638_s13 }
 0x1d4   : > { %p14_p10 = scmp.ge.s32.totalorder %s17_s19, 10   ;;  %s838_s13 = smov %s642_s14 }
 0x1d5   : > { %s839_s14 = smov %s754_s5  ;;  %s840_s15 = smov %s654_s17 }
 0x1d6   : > { %s841_s16 = smov %s658_s18  ;;  %s842_s17 = smov %s845_s21 }
 0x1d7   : > { %s843_s18 = smov %s849_s22  ;;  %16 = sbr.rel (!%p14_p10) target bundleno = 5 (0x5), region = 92 }
 0x1dc   :  { %368 = vsyncpa [#allocation3], 1 }
 0x1dd   :  { %370 = vsyncpa [#allocation3 + $0x1], 1 }

</bundles_post_ra>
